<compile_context>
chip_gen: v6e
topology: v6e:2x2x1
jax: 0.10.0
libtpu: 0.0.40
codegen_flags: <defaults>
</compile_context>

<pallas_src>
import numpy as np
import jax
import jax.numpy as jnp
from jax.experimental import pallas as pl
from jax.experimental.pallas import tpu as pltpu

_MSG = tuple("Hello world from IMX500".encode("ascii"))  # 23 ASCII codes
_W = 224
_ZZ = np.zeros((1, _W), dtype=np.float32)
_ZZ[0, : len(_MSG)] = np.asarray(_MSG, dtype=np.float32)


def _hello_kernel(x_ref, zz_ref, o_ref):
    # x_ref:  (bt, R, W) -- R rows of the last channel; the last row is input[:, -1, -1].
    # zz_ref: (1, W)     -- precomputed ASCII message vector (constant block index).
    # o_ref:  (bt, W)
    R = x_ref.shape[1]
    x = x_ref[:, R - 1, :].astype(jnp.float32)  # (bt, W)
    # torch.sub(oo, oo) + zz -- keeps NaN/Inf propagation of the original module.
    o_ref[...] = (x - x) + zz_ref[...]


def _pick_batch_tile(B: int, rows: int, in_itemsize: int) -> int:
    """VMEM-budget-driven batch tile; >= 2 grid steps whenever B permits."""
    budget = 8 * 1024 * 1024  # ~8 MiB: safe under v5e 16 MiB / v7x 32 MiB scoped limits
    per_elem = rows * _W * in_itemsize + _W * 4  # input + output bytes per batch row
    bt = max(1, budget // (2 * per_elem))        # x2: double-buffered pipeline
    bt = min(bt, 1024, B)
    if bt >= 8:
        bt = (bt // 8) * 8  # keep the output block's sublane dim a multiple of 8
    # Ensure >= 2 grid steps when B permits so dimension_semantics=("parallel",)
    # actually shards the batch across v7x's two TensorCores.
    if B >= 16 and bt >= B:
        half = -(-B // 2)
        bt = min(((half + 7) // 8) * 8, B)
    return max(int(bt), 1)


def neural_network_forward(x: jax.Array) -> jax.Array:
    """x: NCHW array with W == 224. Returns [B, 224] float32."""
    B, C, H, W = x.shape
    assert W == _W, "broadcast with zz[224] requires last dim == 224"

    zz = jnp.asarray(_ZZ)

    if H % 8 == 0:
        # Main path: only the last 8-row sublane group of the last channel is DMA'd.
        rows = 8
        x_in = x
        in_itemsize = x.dtype.itemsize
        bt = _pick_batch_tile(B, rows, in_itemsize)
        x_spec = pl.BlockSpec(
            (bt, pl.Squeezed(), rows, W),
            lambda i: (i, C - 1, H // 8 - 1, 0),
        )
    else:
        # Fallback: tiny wrapper-side slice of the last channel / last row (B*W elems).
        rows = 1
        x_in = x[:, C - 1, H - 1, :].reshape(B, 1, W)
        in_itemsize = x_in.dtype.itemsize
        bt = _pick_batch_tile(B, rows, in_itemsize)
        x_spec = pl.BlockSpec((bt, 1, W), lambda i: (i, 0, 0))

    nb = pl.cdiv(B, bt)

    cost = pl.CostEstimate(
        flops=2 * B * W,  # one sub + one add per output element
        transcendentals=0,
        bytes_accessed=B * rows * W * in_itemsize + B * W * 4 + W * 4,
    )

    return pl.pallas_call(
        _hello_kernel,
        out_shape=jax.ShapeDtypeStruct((B, W), jnp.float32),
        grid=(nb,),
        in_specs=[
            x_spec,
            pl.BlockSpec((1, W), lambda i: (0, 0)),  # zz: constant block, VMEM-resident
        ],
        out_specs=pl.BlockSpec((bt, W), lambda i: (i, 0)),
        compiler_params=pltpu.CompilerParams(
            dimension_semantics=("parallel",),
            vmem_limit_bytes=32 * 1024 * 1024,
        ),
        cost_estimate=cost,
    )(x_in, zz)


if __name__ == "__main__":
    key = jax.random.PRNGKey(0)
    # Small NCHW input consistent with the forward's broadcast requirement (W=224).
    B, C, H, W = 2, 3, 8, 224
    x = jax.random.normal(key, (B, C, H, W), dtype=jnp.float32)

    out = jax.block_until_ready(neural_network_forward(x))

    # Reference (pure JAX): constant broadcast of the ASCII message for finite input.
    zz_ref = (
        jnp.zeros((W,), dtype=jnp.float32)
        .at[0 : len(_MSG)]
        .set(jnp.array(_MSG, dtype=jnp.float32))
    )
    ref = jnp.broadcast_to(zz_ref, (B, W))
    assert out.shape == (B, W)
    assert jnp.allclose(out, ref), "kernel output mismatch vs reference"

    # NaN propagation semantics of torch.sub(oo, oo) are preserved (x path kept).
    x_nan = x.at[0, C - 1, H - 1, 5].set(jnp.nan)
    out_nan = jax.block_until_ready(neural_network_forward(x_nan))
    assert bool(jnp.isnan(out_nan[0, 5])), "NaN should propagate through (x - x)"
    assert jnp.allclose(out_nan[1], ref[1]), "non-NaN rows must match reference"

    # Fallback path: H not a multiple of 8 (wrapper-side last-row slice).
    x_odd = jax.random.normal(key, (B, C, 5, W), dtype=jnp.float32)
    out_odd = jax.block_until_ready(neural_network_forward(x_odd))
    assert jnp.allclose(out_odd, ref), "fallback path mismatch vs reference"

    print("KERNEL_OK")
</pallas_src>

<mosaic_0001>
module attributes {stable_mosaic.version = 11 : i64} {
  func.func @_hello_kernel(%arg0: i32, %arg1: memref<2x1x8x224xf32, #tpu.memory_space<vmem>>, %arg2: memref<1x224xf32, #tpu.memory_space<vmem>>, %arg3: memref<2x224xf32, #tpu.memory_space<vmem>>) attributes {dimension_semantics = [#tpu.dimension_semantics<parallel>], iteration_bounds = array<i64: 1>, scalar_prefetch = 0 : i64, scratch_operands = 0 : i64, tpu.core_type = #tpu.core_type<tc>, window_params = [{transform_indices = @transform_0, window_bounds = array<i64: 2, 1, 8, 224>}, {pipeline_mode = #tpu.pipeline_mode<synchronous>, transform_indices = @transform_1, window_bounds = array<i64: 1, 224>}, {transform_indices = @transform_2, window_bounds = array<i64: 2, 224>}]} {
    %c0 = arith.constant 0 : index
    %c0_0 = arith.constant 0 : index
    %c7 = arith.constant 7 : index
    %c0_1 = arith.constant 0 : index
    %0 = vector.load %arg1[%c0, %c0_0, %c7, %c0_1] : memref<2x1x8x224xf32, #tpu.memory_space<vmem>>, vector<2x1x1x224xf32>
    %1 = vector.shape_cast %0 : vector<2x1x1x224xf32> to vector<2x224xf32>
    %2 = arith.subf %1, %1 : vector<2x224xf32>
    %c0_2 = arith.constant 0 : index
    %c0_3 = arith.constant 0 : index
    %3 = vector.load %arg2[%c0_2, %c0_3] : memref<1x224xf32, #tpu.memory_space<vmem>>, vector<1x224xf32>
    %4 = vector.broadcast %3 : vector<1x224xf32> to vector<2x224xf32>
    %5 = arith.addf %2, %4 : vector<2x224xf32>
    %c0_4 = arith.constant 0 : index
    %c0_5 = arith.constant 0 : index
    %6 = vector.load %arg3[%c0_4, %c0_5] : memref<2x224xf32, #tpu.memory_space<vmem>>, vector<2x224xf32>
    tpu.vector_store %arg3[%c0_4, %c0_5], %5 {strides = array<i32>} : memref<2x224xf32, #tpu.memory_space<vmem>>, vector<2x224xf32>,
    return
  }
  func.func @transform_0(%arg0: i32) -> (i32, i32, i32, i32) {
    %c2_i32 = arith.constant 2 : i32
    %c0_i32 = arith.constant 0 : i32
    %c0_i32_0 = arith.constant 0 : i32
    %c0_i32_1 = arith.constant 0 : i32
    return %arg0, %c2_i32, %c0_i32, %c0_i32_0 : i32, i32, i32, i32
  }
  func.func @transform_1(%arg0: i32) -> (i32, i32) {
    %c0_i32 = arith.constant 0 : i32
    %c0_i32_0 = arith.constant 0 : i32
    %c0_i32_1 = arith.constant 0 : i32
    return %c0_i32, %c0_i32_0 : i32, i32
  }
  func.func @transform_2(%arg0: i32) -> (i32, i32) {
    %c0_i32 = arith.constant 0 : i32
    %c0_i32_0 = arith.constant 0 : i32
    return %arg0, %c0_i32 : i32, i32
  }
}

</mosaic_0001>

<bundles_post_ra>
// kernel: tpu_custom_call.1
= control target key start
LH: loop header
LB: loop body
LE: loop exit
PB: predicated region body
PF: predicated region fallthrough
CT: control target
= control target key end

     0   :  { %7 = vsyncpa [#allocation3], 0  ;;  %s222_s0 = inlined_call_operand.hbm [shape: f32[2,3,8,224], index: 0, kind: input, shape index: {}]   ;;  %s223_s1 = inlined_call_operand.hbm [shape: f32[1,224], index: 1, kind: input, shape index: {}]   ;;  %s224_s2 = inlined_call_operand.hbm [shape: f32[2,224], index: 2, kind: output, shape index: {}]  }
   0x1   :  { %8 = vsyncpa [#allocation6], 0 }
   0x2   :  { %9 = vsyncpa [#allocation4], 0  ;;  %s15_s11 = scalar_lea.hbm %s222_s0, 512  ;;  %s190_s12 = smov [#allocation2]  }
   0x3   :  { %s16_s13 = sshll.u32 %s190_s12, 4  ;;  %s17_s13 = int_to_ptr.vmem [resolvable:$true] %s16_s13 }
   0x4   :  { %s131_s14 = scalar_lea.vmem %s17_s13, 512  ;;  %p136_p1 = scmp.lt.s32.totalorder %s17_s13, %s17_s13 }
   0x5   :  { %p132_p0 = scmp.ne.s32.totalorder %s17_s13, %s131_s14  ;;  %p137_p2 = scmp.lt.s32.totalorder %s131_s14, %s131_s14 }
   0x7   :  { %p138_p3 = por %p137_p2, %p136_p1 }
   0x9   :  { %p139_p4 = pnand %p138_p3, %p132_p0 }
   0xb   :  { %142 = shalt.err (!%p139_p4)
}
   0xc   :  { %s191_s15 = smov 768   ;;  %s192_s16 = smov 256  }
   0xd   :  { %s193_s17 = smov 16   ;;  %s194_s18 = smov [#allocation5]  }
   0xe   :  { %22 = dma.hbm_to_vmem [thread:$0]  %s15_s11, 512, %s17_s13, [#allocation3], %s191_s15, %s192_s16, %s193_s17  }
   0xf   :  { %s29_s19 = sshll.u32 %s194_s18, 4  ;;  %s30_s19 = int_to_ptr.vmem [resolvable:$true] %s29_s19 }
  0x10   :  { %s152_s20 = scalar_lea.vmem %s30_s19, 32  ;;  %p157_p6 = scmp.lt.s32.totalorder %s30_s19, %s30_s19 }
  0x11   :  { %p153_p5 = scmp.ne.s32.totalorder %s30_s19, %s152_s20  ;;  %p158_p7 = scmp.lt.s32.totalorder %s152_s20, %s152_s20 }
  0x13   :  { %p159_p8 = por %p158_p7, %p157_p6 }
  0x15   :  { %p160_p9 = pnand %p159_p8, %p153_p5 }
  0x17   :  { %163 = shalt.err (!%p160_p9)
}
  0x18   :  { %32 = dma.hbm_to_vmem [thread:$0]  %s223_s1, 32, %s30_s19, [#allocation6]  }
  0x19   :  { %184 = dma.done.wait [#allocation3], 512  }
  0x1a   :  { %185 = vsyncadd [#allocation3], 4294966784 }
  0x1b   :  { %186 = dma.done.wait [#allocation6], 32  }
  0x1c   :  { %187 = vsyncadd [#allocation6], 4294967264  ;;  %v47_v0 = vlaneseq  ;;  %v195_v1 = vmov 1966171168   ;;  %v45_v7 = vld [vmem:[#allocation5] sm:$0x3] }
  0x1d   :  { %v57_v2 = vunpack.c.l.s4 %v195_v1  ;;  %v40_v11 = vld [vmem:[#allocation2 + $0x7] ss:$8 sm:$0x3]  ;;  %v196_v13 = vmov 1935823168   ;;  %vm93_vm0 = vcmask 1041408  }
  0x1e   :  { %v48_v3 = vshrl.u32 %v47_v0, 7  ;;  %v86_v14 = vunpack.c.l.s4 %v196_v13  ;;  %v42_v15 = vld [vmem:[#allocation2 + $0x17] ss:$8 sm:$0x3]  ;;  %v43_v16 = vsub.f32 %v40_v11, %v40_v11  ;;  %vm94_vm1 = vcmask 781314   ;;  %s197_s1 = smov [#allocation7]  }
  0x1f   :  { %v58_v6 = vunpack.c.0.s8 %v57_v2  ;;  %v44_v18 = vsub.f32 %v42_v15, %v42_v15  ;;  %s103_s22 = sshll.u32 %s197_s1, 4  ;;  %vm95_vm2 = vmor %vm94_vm1, %vm93_vm0  ;;  %s104_s22 = int_to_ptr.vmem [resolvable:$true] %s103_s22 }
  0x20   :  { %v49_v4 = vsub.s32 0, %v48_v3  ;;  %v53_v5 = vsub.s32 1, %v48_v3  ;;  %v87_v21 = vunpack.c.0.s8 %v86_v14  ;;  %s164_s23 = scalar_lea.vmem %s104_s22, 64  ;;  %p169_p11 = scmp.lt.s32.totalorder %s104_s22, %s104_s22 }
  0x21   :  { %v61_v10 = vsub.s32 %v58_v6, %v48_v3  ;;  %p165_p10 = scmp.ne.s32.totalorder %s104_s22, %s164_s23  ;;  %p170_p12 = scmp.lt.s32.totalorder %s164_s23, %s164_s23 }
  0x22   :  { %v50_v8 = vrot.slane %v45_v7, %v49_v4  ;;  %v54_v9 = vrot.slane %v45_v7, %v53_v5  ;;  %v90_v25 = vsub.s32 %v87_v21, %v48_v3 }
  0x23   :  { %p171_p13 = por %p170_p12, %p169_p11 }
  0x24   :  { %v55_v12 = vcombine.low %v50_v8, %v54_v9 }
  0x25   :  { %p172_p0 = pnand %p171_p13, %p165_p10 }
  0x26   :  { %v62_v17 = vrot.slane %v55_v12, %v61_v10 }
  0x28   :  { %v63_v19 = vcombine.high %v62_v17, %v62_v17  ;;  %v70_v20 = vrot.slane %v62_v17, %v61_v10 }
  0x2a   :  { %v77_v22 = vrot.slane %v63_v19, %v61_v10  ;;  %v80_v23 = vadd.f32 %v70_v20, %v43_v16 }
  0x2c   :  { %v81_v24 = vadd.f32 %v77_v22, %v44_v18 }
  0x2e   :  { %v84_v26 = vcombine.low %v80_v23, %v81_v24 }
  0x30   :  { %v91_v27 = vrot.slane %v84_v26, %v90_v25 }
  0x32   :  { %96 = vst.msk [vmem:[#allocation7] sm:$0xf] %vm95_vm2, %v91_v27 }
  0x33   :  { %175 = shalt.err (!%p172_p0)
}
  0x34   :  { %106 = dma.vmem_to_hbm [thread:$0]  %s104_s22, 64, %s224_s2, [#allocation4]  }
  0x35   :  { %188 = dma.done.wait [#allocation4], 64  }
  0x36   :  { %189 = vsyncadd [#allocation4], 4294967232 }
  0x37   :  { %110 = vsyncpa [#allocation3], 1 }
  0x38   :  { %111 = vsyncpa [#allocation6], 1 }
  0x39   :  { %112 = vsyncpa [#allocation4], 1 }

</bundles_post_ra>
